<compile_context>
chip_gen: v6e
topology: v6e:2x2x1
jax: 0.10.0
libtpu: 0.0.40
codegen_flags: <defaults>
</compile_context>

<pallas_src>
import functools
import math

import jax
import jax.numpy as jnp
from jax.experimental import pallas as pl
from jax.experimental.pallas import tpu as pltpu


def _layernorm(y, g, b, eps):
    mu = jnp.mean(y, axis=-1, keepdims=True)
    var = jnp.mean(jnp.square(y - mu), axis=-1, keepdims=True)
    return (y - mu) * jax.lax.rsqrt(var + eps) * g + b


# ---------------------------------------------------------------------------
# Fused kernel: one grid step = one (batch_block, layer) pair.
# ---------------------------------------------------------------------------
def _fused_encoder_kernel(x_ref,
                          wqkv_ref, bqkv_ref, wo_ref, bo_ref,
                          ln1_g_ref, ln1_b_ref,
                          w1_ref, b1_ref, w2_ref, b2_ref,
                          ln2_g_ref, ln2_b_ref,
                          o_ref,
                          h_ref,
                          *, num_heads, batch_block, seq_len, d_model,
                          compute_dtype, eps=1e-5):
    layer = pl.program_id(1)
    Bb, S, D, H = batch_block, seq_len, d_model, num_heads
    dh = D // H
    cd = compute_dtype

    # Layer 0 of each batch block: load the activation once; it then stays
    # resident in VMEM scratch across all layer grid steps.
    @pl.when(layer == 0)
    def _():
        h_ref[...] = x_ref[...].astype(jnp.float32)

    h = h_ref[...]                                          # (Bb*S, D) f32

    def mm(a, w):
        # weights already arrive in the compute dtype from the wrapper
        return jnp.dot(a.astype(cd), w, preferred_element_type=jnp.float32)

    # ---- fused QKV projection: one MXU pass with N = 3*D -------------------
    # (1/sqrt(dh) is pre-folded into the Q columns of wqkv / bqkv.)
    qkv = mm(h, wqkv_ref[...]) + bqkv_ref[...]              # (Bb*S, 3D) f32
    # leading-dim split only (sublane-tile aligned when S % 8 == 0) — free.
    qkv3 = qkv.reshape(Bb, S, 3 * D)

    # ---- multi-head self-attention ------------------------------------------
    # Batched over the batch dim with 3-D einsums; small static loop over
    # heads (H lane slices taken directly from the fused QKV tensor, no
    # per-(batch,head) unroll, single concat at the end).
    ctx_heads = []
    for hh in range(H):
        qh = qkv3[:, :, hh * dh:(hh + 1) * dh].astype(cd)           # (Bb,S,dh)
        kh = qkv3[:, :, D + hh * dh:D + (hh + 1) * dh].astype(cd)
        vh = qkv3[:, :, 2 * D + hh * dh:2 * D + (hh + 1) * dh].astype(cd)

        s = jnp.einsum('bqd,bkd->bqk', qh, kh,
                       preferred_element_type=jnp.float32)          # (Bb,S,S)
        m = jnp.max(s, axis=-1, keepdims=True)
        e = jnp.exp(s - m)
        p = e / jnp.sum(e, axis=-1, keepdims=True)   # exact softmax denom
        ctx_heads.append(
            jnp.einsum('bqk,bkd->bqd', p.astype(cd), vh,
                       preferred_element_type=jnp.float32))          # (Bb,S,dh)

    ctx = jnp.concatenate(ctx_heads, axis=-1).reshape(Bb * S, D)     # (Bb*S, D)

    attn = mm(ctx, wo_ref[...]) + bo_ref[...]

    # ---- add & LayerNorm 1 ---------------------------------------------------
    y = _layernorm(h + attn, ln1_g_ref[...], ln1_b_ref[...], eps)

    # ---- feed-forward (relu) + add & LayerNorm 2 ----------------------------
    h1 = jnp.maximum(mm(y, w1_ref[...]) + b1_ref[...], 0.0)
    z = _layernorm(y + mm(h1, w2_ref[...]) + b2_ref[...],
                   ln2_g_ref[...], ln2_b_ref[...], eps)

    h_ref[...] = z

    @pl.when(layer == pl.num_programs(1) - 1)
    def _():
        o_ref[...] = z.astype(o_ref.dtype)


# ---------------------------------------------------------------------------
# Wrapper: single pallas_call for the whole encoder stack.
# ---------------------------------------------------------------------------
def object_detection_ordinal_head(x, layer_params, num_heads,
                                  *, batch_blocks=1,
                                  compute_dtype=jnp.float32,
                                  core_parallel=False):
    """Forward of ObjectDetectionOrdinalHead (stacked transformer encoder)."""
    B, S, D = x.shape
    L = len(layer_params)
    H = num_heads
    assert D % H == 0
    assert B % batch_blocks == 0
    Bb = B // batch_blocks
    dh = D // H
    scale = 1.0 / math.sqrt(dh)
    cd = compute_dtype
    d_ff = layer_params[0]["w1"].shape[1]

    # Pack Q/K/V into one (D, 3D) projection per layer (torch in_proj layout),
    # folding the attention scale into the Q columns (free at weight prep).
    wqkv = jnp.stack(
        [jnp.concatenate([p["wq"] * scale, p["wk"], p["wv"]], axis=1)
         for p in layer_params], axis=0).astype(cd)          # (L, D, 3D)
    bqkv = jnp.stack(
        [jnp.concatenate([p["bq"] * scale, p["bk"], p["bv"]], axis=1)
         for p in layer_params], axis=0)                     # (L, 1, 3D) f32

    def stack(name, dtype=None):
        a = jnp.stack([p[name] for p in layer_params], axis=0)
        return a.astype(dtype) if dtype is not None else a

    # Matmul weights streamed in the compute dtype (bf16 halves DMA bytes and
    # VMEM at production sizes); biases / LN params stay f32.
    weights = [wqkv, bqkv,
               stack("wo", cd), stack("bo"),
               stack("ln1_g"), stack("ln1_b"),
               stack("w1", cd), stack("b1"),
               stack("w2", cd), stack("b2"),
               stack("ln2_g"), stack("ln2_b")]

    def w_spec(arr):
        trailing = arr.shape[1:]
        return pl.BlockSpec(
            (pl.Squeezed(),) + trailing,
            lambda b, l, _n=len(trailing): (l,) + (0,) * _n)

    # Fold batch*seq into the matmul M dimension.
    x2 = x.reshape(B * S, D)
    M = Bb * S

    # Explicit VMEM budget: double-buffered per-layer weights + resident
    # activation scratch + I/O blocks + per-step intermediates + headroom.
    w_item = jnp.dtype(cd).itemsize
    w_bytes = (D * 3 * D + D * D + 2 * D * d_ff) * w_item \
              + (3 * D + D + d_ff + D + 4 * D) * 4
    inter = (M * 3 * D + M * d_ff + 3 * M * D + 2 * Bb * S * S) * 4
    est = 2 * w_bytes + M * D * 4 + 4 * M * D * 4 + inter
    vmem_limit = max(32 << 20, min(int(est * 1.5), 100 << 20))

    batch_sem = pltpu.CORE_PARALLEL if core_parallel else "parallel"

    out = pl.pallas_call(
        functools.partial(_fused_encoder_kernel,
                          num_heads=H, batch_block=Bb,
                          seq_len=S, d_model=D, compute_dtype=cd),
        out_shape=jax.ShapeDtypeStruct((B * S, D), x.dtype),
        grid_spec=pltpu.PrefetchScalarGridSpec(
            num_scalar_prefetch=0,
            grid=(batch_blocks, L),
            in_specs=[pl.BlockSpec((M, D), lambda b, l: (b, 0))]
                     + [w_spec(w) for w in weights],
            out_specs=pl.BlockSpec((M, D), lambda b, l: (b, 0)),
            scratch_shapes=[pltpu.VMEM((M, D), jnp.float32)],
        ),
        compiler_params=pltpu.CompilerParams(
            dimension_semantics=(batch_sem, "arbitrary"),
            vmem_limit_bytes=vmem_limit),
    )(x2, *weights)
    return out.reshape(B, S, D)


# ---------------------------------------------------------------------------
# Deterministic parameter init + pure-JAX reference check.
# ---------------------------------------------------------------------------
def init_layer_params(key, d_model, d_ff):
    ks = jax.random.split(key, 8)
    s = 1.0 / math.sqrt(d_model)
    return {
        "wq": jax.random.normal(ks[0], (d_model, d_model), jnp.float32) * s,
        "bq": jnp.zeros((1, d_model), jnp.float32),
        "wk": jax.random.normal(ks[1], (d_model, d_model), jnp.float32) * s,
        "bk": jnp.zeros((1, d_model), jnp.float32),
        "wv": jax.random.normal(ks[2], (d_model, d_model), jnp.float32) * s,
        "bv": jnp.zeros((1, d_model), jnp.float32),
        "wo": jax.random.normal(ks[3], (d_model, d_model), jnp.float32) * s,
        "bo": jnp.zeros((1, d_model), jnp.float32),
        "ln1_g": jnp.ones((1, d_model), jnp.float32),
        "ln1_b": jnp.zeros((1, d_model), jnp.float32),
        "w1": jax.random.normal(ks[4], (d_model, d_ff), jnp.float32) * s,
        "b1": jnp.zeros((1, d_ff), jnp.float32),
        "w2": jax.random.normal(ks[5], (d_ff, d_model), jnp.float32)
              * (1.0 / math.sqrt(d_ff)),
        "b2": jnp.zeros((1, d_model), jnp.float32),
        "ln2_g": jnp.ones((1, d_model), jnp.float32),
        "ln2_b": jnp.zeros((1, d_model), jnp.float32),
    }


def _reference_layer(x, p, num_heads):
    B, S, D = x.shape
    dh = D // num_heads

    def mha(xb):
        q = xb @ p["wq"] + p["bq"][0]
        k = xb @ p["wk"] + p["bk"][0]
        v = xb @ p["wv"] + p["bv"][0]
        q = q.reshape(S, num_heads, dh).transpose(1, 0, 2)
        k = k.reshape(S, num_heads, dh).transpose(1, 0, 2)
        v = v.reshape(S, num_heads, dh).transpose(1, 0, 2)
        sc = jnp.einsum("hqd,hkd->hqk", q, k) / math.sqrt(dh)
        a = jax.nn.softmax(sc, axis=-1)
        ctx = jnp.einsum("hqk,hkd->hqd", a, v).transpose(1, 0, 2).reshape(S, D)
        return ctx @ p["wo"] + p["bo"][0]

    def ln(y, g, b):
        mu = y.mean(-1, keepdims=True)
        var = ((y - mu) ** 2).mean(-1, keepdims=True)
        return (y - mu) / jnp.sqrt(var + 1e-5) * g[0] + b[0]

    out = []
    for b in range(B):
        xb = x[b]
        y = ln(xb + mha(xb), p["ln1_g"], p["ln1_b"])
        ffn = jnp.maximum(y @ p["w1"] + p["b1"][0], 0.0) @ p["w2"] + p["b2"][0]
        out.append(ln(y + ffn, p["ln2_g"], p["ln2_b"]))
    return jnp.stack(out)


if __name__ == "__main__":
    B, S, D = 2, 8, 32          # batch, sequence length, d_model
    num_heads = 4
    d_ff = 64
    num_layers = 2

    root = jax.random.PRNGKey(0)
    kx, *kl = jax.random.split(root, 1 + num_layers)
    x = jax.random.normal(kx, (B, S, D), jnp.float32)
    layer_params = [init_layer_params(k, D, d_ff) for k in kl]

    # default: single grid step over the whole batch (B*S folded into M)
    out = object_detection_ordinal_head(x, layer_params, num_heads)
    out = jax.block_until_ready(out)

    # multi-block batch axis (e.g. for v7x core-parallel sharding)
    out2 = object_detection_ordinal_head(x, layer_params, num_heads,
                                         batch_blocks=2)
    out2 = jax.block_until_ready(out2)

    # pure-JAX reference
    ref = x
    for p in layer_params:
        ref = _reference_layer(ref, p, num_heads)

    assert out.shape == (B, S, D)
    # f32 compute, exact softmax denominator -> tight tolerance.
    assert jnp.allclose(out, ref, atol=2e-4, rtol=2e-4)
    assert jnp.allclose(out2, ref, atol=2e-4, rtol=2e-4)

    print("KERNEL_OK")
</pallas_src>

<mosaic_0001>
module attributes {stable_mosaic.version = 11 : i64} {
  func.func @_fused_encoder_kernel(%arg0: i32, %arg1: i32, %arg2: memref<16x32xf32, #tpu.memory_space<vmem>>, %arg3: memref<1x32x96xf32, #tpu.memory_space<vmem>>, %arg4: memref<1x1x96xf32, #tpu.memory_space<vmem>>, %arg5: memref<1x32x32xf32, #tpu.memory_space<vmem>>, %arg6: memref<1x1x32xf32, #tpu.memory_space<vmem>>, %arg7: memref<1x1x32xf32, #tpu.memory_space<vmem>>, %arg8: memref<1x1x32xf32, #tpu.memory_space<vmem>>, %arg9: memref<1x32x64xf32, #tpu.memory_space<vmem>>, %arg10: memref<1x1x64xf32, #tpu.memory_space<vmem>>, %arg11: memref<1x64x32xf32, #tpu.memory_space<vmem>>, %arg12: memref<1x1x32xf32, #tpu.memory_space<vmem>>, %arg13: memref<1x1x32xf32, #tpu.memory_space<vmem>>, %arg14: memref<1x1x32xf32, #tpu.memory_space<vmem>>, %arg15: memref<16x32xf32, #tpu.memory_space<vmem>>, %arg16: memref<16x32xf32, #tpu.memory_space<vmem>>) attributes {dimension_semantics = [#tpu.dimension_semantics<parallel>, #tpu.dimension_semantics<arbitrary>], iteration_bounds = array<i64: 1, 2>, scalar_prefetch = 0 : i64, scratch_operands = 1 : i64, tpu.core_type = #tpu.core_type<tc>, window_params = [{transform_indices = @transform_0, window_bounds = array<i64: 16, 32>}, {transform_indices = @transform_1, window_bounds = array<i64: 1, 32, 96>}, {transform_indices = @transform_2, window_bounds = array<i64: 1, 1, 96>}, {transform_indices = @transform_3, window_bounds = array<i64: 1, 32, 32>}, {transform_indices = @transform_4, window_bounds = array<i64: 1, 1, 32>}, {transform_indices = @transform_5, window_bounds = array<i64: 1, 1, 32>}, {transform_indices = @transform_6, window_bounds = array<i64: 1, 1, 32>}, {transform_indices = @transform_7, window_bounds = array<i64: 1, 32, 64>}, {transform_indices = @transform_8, window_bounds = array<i64: 1, 1, 64>}, {transform_indices = @transform_9, window_bounds = array<i64: 1, 64, 32>}, {transform_indices = @transform_10, window_bounds = array<i64: 1, 1, 32>}, {transform_indices = @transform_11, window_bounds = array<i64: 1, 1, 32>}, {transform_indices = @transform_12, window_bounds = array<i64: 1, 1, 32>}, {transform_indices = @transform_13, window_bounds = array<i64: 16, 32>}]} {
    %c0_i32 = arith.constant 0 : i32
    %0 = arith.cmpi eq, %arg1, %c0_i32 : i32
    %1 = arith.extui %0 : i1 to i32
    %c0_i32_0 = arith.constant 0 : i32
    %2 = arith.cmpi ne, %1, %c0_i32_0 : i32
    scf.if %2 {
      %c0_71 = arith.constant 0 : index
      %c0_72 = arith.constant 0 : index
      %151 = vector.load %arg2[%c0_71, %c0_72] : memref<16x32xf32, #tpu.memory_space<vmem>>, vector<16x32xf32>
      %c0_73 = arith.constant 0 : index
      %c0_74 = arith.constant 0 : index
      %152 = vector.load %arg16[%c0_73, %c0_74] : memref<16x32xf32, #tpu.memory_space<vmem>>, vector<16x32xf32>
      tpu.vector_store %arg16[%c0_73, %c0_74], %151 {strides = array<i32>} : memref<16x32xf32, #tpu.memory_space<vmem>>, vector<16x32xf32>,
    } else {
    }
    %c0 = arith.constant 0 : index
    %c0_1 = arith.constant 0 : index
    %3 = vector.load %arg16[%c0, %c0_1] : memref<16x32xf32, #tpu.memory_space<vmem>>, vector<16x32xf32>
    %c0_2 = arith.constant 0 : index
    %c0_3 = arith.constant 0 : index
    %c0_4 = arith.constant 0 : index
    %4 = vector.load %arg3[%c0_2, %c0_3, %c0_4] : memref<1x32x96xf32, #tpu.memory_space<vmem>>, vector<1x32x96xf32>
    %5 = vector.shape_cast %4 : vector<1x32x96xf32> to vector<32x96xf32>
    %cst = arith.constant dense<0.000000e+00> : vector<16x96xf32>
    %6 = tpu.matmul %3, %5, %cst {dimension_numbers = #tpu.dot_dimension_numbers<[1], [0], [0], [1], [0, 0, 1, 1], [], []>} : vector<16x32xf32>, vector<32x96xf32>, vector<16x96xf32> -> vector<16x96xf32>
    %c0_5 = arith.constant 0 : index
    %c0_6 = arith.constant 0 : index
    %c0_7 = arith.constant 0 : index
    %7 = vector.load %arg4[%c0_5, %c0_6, %c0_7] : memref<1x1x96xf32, #tpu.memory_space<vmem>>, vector<1x1x96xf32>
    %8 = vector.shape_cast %7 : vector<1x1x96xf32> to vector<1x96xf32>
    %9 = vector.broadcast %8 : vector<1x96xf32> to vector<16x96xf32>
    %10 = arith.addf %6, %9 : vector<16x96xf32>
    %11 = vector.shape_cast %10 : vector<16x96xf32> to vector<2x8x96xf32>
    %12 = vector.extract_strided_slice %11 {offsets = [0, 0, 0], sizes = [2, 8, 8], strides = [1, 1, 1]} : vector<2x8x96xf32> to vector<2x8x8xf32>
    %13 = vector.extract_strided_slice %11 {offsets = [0, 0, 32], sizes = [2, 8, 8], strides = [1, 1, 1]} : vector<2x8x96xf32> to vector<2x8x8xf32>
    %14 = vector.extract_strided_slice %11 {offsets = [0, 0, 64], sizes = [2, 8, 8], strides = [1, 1, 1]} : vector<2x8x96xf32> to vector<2x8x8xf32>
    "tpu.trace_start"() <{level = 10 : i32, message = "bqd,bkd->bqk"}> : () -> ()
    %cst_8 = arith.constant dense<0.000000e+00> : vector<2x8x8xf32>
    %15 = tpu.matmul %12, %13, %cst_8 {dimension_numbers = #tpu.dot_dimension_numbers<[2], [2], [1], [1], [0, 0, 0, 1, 1, 1], [0], [0]>} : vector<2x8x8xf32>, vector<2x8x8xf32>, vector<2x8x8xf32> -> vector<2x8x8xf32>
    "tpu.trace_stop"() : () -> ()
    %cst_9 = arith.constant dense<0xFF800000> : vector<2x8xf32>
    %16 = vector.multi_reduction <maximumf>, %15, %cst_9 [2] : vector<2x8x8xf32> to vector<2x8xf32>
    %17 = vector.shape_cast %16 : vector<2x8xf32> to vector<2x8x1xf32>
    %18 = vector.broadcast %17 : vector<2x8x1xf32> to vector<2x8x8xf32>
    %19 = arith.subf %15, %18 : vector<2x8x8xf32>
    %20 = math.exp %19 : vector<2x8x8xf32>
    %cst_10 = arith.constant dense<0.000000e+00> : vector<2x8xf32>
    %21 = vector.multi_reduction <add>, %20, %cst_10 [2] : vector<2x8x8xf32> to vector<2x8xf32>
    %22 = vector.shape_cast %21 : vector<2x8xf32> to vector<2x8x1xf32>
    %23 = vector.broadcast %22 : vector<2x8x1xf32> to vector<2x8x8xf32>
    %24 = arith.divf %20, %23 : vector<2x8x8xf32>
    "tpu.trace_start"() <{level = 10 : i32, message = "bqk,bkd->bqd"}> : () -> ()
    %cst_11 = arith.constant dense<0.000000e+00> : vector<2x8x8xf32>
    %25 = tpu.matmul %24, %14, %cst_11 {dimension_numbers = #tpu.dot_dimension_numbers<[2], [1], [1], [2], [0, 0, 0, 1, 1, 2], [0], [0]>} : vector<2x8x8xf32>, vector<2x8x8xf32>, vector<2x8x8xf32> -> vector<2x8x8xf32>
    "tpu.trace_stop"() : () -> ()
    %26 = vector.extract_strided_slice %11 {offsets = [0, 0, 8], sizes = [2, 8, 8], strides = [1, 1, 1]} : vector<2x8x96xf32> to vector<2x8x8xf32>
    %27 = vector.extract_strided_slice %11 {offsets = [0, 0, 40], sizes = [2, 8, 8], strides = [1, 1, 1]} : vector<2x8x96xf32> to vector<2x8x8xf32>
    %28 = vector.extract_strided_slice %11 {offsets = [0, 0, 72], sizes = [2, 8, 8], strides = [1, 1, 1]} : vector<2x8x96xf32> to vector<2x8x8xf32>
    "tpu.trace_start"() <{level = 10 : i32, message = "bqd,bkd->bqk"}> : () -> ()
    %cst_12 = arith.constant dense<0.000000e+00> : vector<2x8x8xf32>
    %29 = tpu.matmul %26, %27, %cst_12 {dimension_numbers = #tpu.dot_dimension_numbers<[2], [2], [1], [1], [0, 0, 0, 1, 1, 1], [0], [0]>} : vector<2x8x8xf32>, vector<2x8x8xf32>, vector<2x8x8xf32> -> vector<2x8x8xf32>
    "tpu.trace_stop"() : () -> ()
    %cst_13 = arith.constant dense<0xFF800000> : vector<2x8xf32>
    %30 = vector.multi_reduction <maximumf>, %29, %cst_13 [2] : vector<2x8x8xf32> to vector<2x8xf32>
    %31 = vector.shape_cast %30 : vector<2x8xf32> to vector<2x8x1xf32>
    %32 = vector.broadcast %31 : vector<2x8x1xf32> to vector<2x8x8xf32>
    %33 = arith.subf %29, %32 : vector<2x8x8xf32>
    %34 = math.exp %33 : vector<2x8x8xf32>
    %cst_14 = arith.constant dense<0.000000e+00> : vector<2x8xf32>
    %35 = vector.multi_reduction <add>, %34, %cst_14 [2] : vector<2x8x8xf32> to vector<2x8xf32>
    %36 = vector.shape_cast %35 : vector<2x8xf32> to vector<2x8x1xf32>
    %37 = vector.broadcast %36 : vector<2x8x1xf32> to vector<2x8x8xf32>
    %38 = arith.divf %34, %37 : vector<2x8x8xf32>
    "tpu.trace_start"() <{level = 10 : i32, message = "bqk,bkd->bqd"}> : () -> ()
    %cst_15 = arith.constant dense<0.000000e+00> : vector<2x8x8xf32>
    %39 = tpu.matmul %38, %28, %cst_15 {dimension_numbers = #tpu.dot_dimension_numbers<[2], [1], [1], [2], [0, 0, 0, 1, 1, 2], [0], [0]>} : vector<2x8x8xf32>, vector<2x8x8xf32>, vector<2x8x8xf32> -> vector<2x8x8xf32>
    "tpu.trace_stop"() : () -> ()
    %40 = vector.extract_strided_slice %11 {offsets = [0, 0, 16], sizes = [2, 8, 8], strides = [1, 1, 1]} : vector<2x8x96xf32> to vector<2x8x8xf32>
    %41 = vector.extract_strided_slice %11 {offsets = [0, 0, 48], sizes = [2, 8, 8], strides = [1, 1, 1]} : vector<2x8x96xf32> to vector<2x8x8xf32>
    %42 = vector.extract_strided_slice %11 {offsets = [0, 0, 80], sizes = [2, 8, 8], strides = [1, 1, 1]} : vector<2x8x96xf32> to vector<2x8x8xf32>
    "tpu.trace_start"() <{level = 10 : i32, message = "bqd,bkd->bqk"}> : () -> ()
    %cst_16 = arith.constant dense<0.000000e+00> : vector<2x8x8xf32>
    %43 = tpu.matmul %40, %41, %cst_16 {dimension_numbers = #tpu.dot_dimension_numbers<[2], [2], [1], [1], [0, 0, 0, 1, 1, 1], [0], [0]>} : vector<2x8x8xf32>, vector<2x8x8xf32>, vector<2x8x8xf32> -> vector<2x8x8xf32>
    "tpu.trace_stop"() : () -> ()
    %cst_17 = arith.constant dense<0xFF800000> : vector<2x8xf32>
    %44 = vector.multi_reduction <maximumf>, %43, %cst_17 [2] : vector<2x8x8xf32> to vector<2x8xf32>
    %45 = vector.shape_cast %44 : vector<2x8xf32> to vector<2x8x1xf32>
    %46 = vector.broadcast %45 : vector<2x8x1xf32> to vector<2x8x8xf32>
    %47 = arith.subf %43, %46 : vector<2x8x8xf32>
    %48 = math.exp %47 : vector<2x8x8xf32>
    %cst_18 = arith.constant dense<0.000000e+00> : vector<2x8xf32>
    %49 = vector.multi_reduction <add>, %48, %cst_18 [2] : vector<2x8x8xf32> to vector<2x8xf32>
    %50 = vector.shape_cast %49 : vector<2x8xf32> to vector<2x8x1xf32>
    %51 = vector.broadcast %50 : vector<2x8x1xf32> to vector<2x8x8xf32>
    %52 = arith.divf %48, %51 : vector<2x8x8xf32>
    "tpu.trace_start"() <{level = 10 : i32, message = "bqk,bkd->bqd"}> : () -> ()
    %cst_19 = arith.constant dense<0.000000e+00> : vector<2x8x8xf32>
    %53 = tpu.matmul %52, %42, %cst_19 {dimension_numbers = #tpu.dot_dimension_numbers<[2], [1], [1], [2], [0, 0, 0, 1, 1, 2], [0], [0]>} : vector<2x8x8xf32>, vector<2x8x8xf32>, vector<2x8x8xf32> -> vector<2x8x8xf32>
    "tpu.trace_stop"() : () -> ()
    %54 = vector.extract_strided_slice %11 {offsets = [0, 0, 24], sizes = [2, 8, 8], strides = [1, 1, 1]} : vector<2x8x96xf32> to vector<2x8x8xf32>
    %55 = vector.extract_strided_slice %11 {offsets = [0, 0, 56], sizes = [2, 8, 8], strides = [1, 1, 1]} : vector<2x8x96xf32> to vector<2x8x8xf32>
    %56 = vector.extract_strided_slice %11 {offsets = [0, 0, 88], sizes = [2, 8, 8], strides = [1, 1, 1]} : vector<2x8x96xf32> to vector<2x8x8xf32>
    "tpu.trace_start"() <{level = 10 : i32, message = "bqd,bkd->bqk"}> : () -> ()
    %cst_20 = arith.constant dense<0.000000e+00> : vector<2x8x8xf32>
    %57 = tpu.matmul %54, %55, %cst_20 {dimension_numbers = #tpu.dot_dimension_numbers<[2], [2], [1], [1], [0, 0, 0, 1, 1, 1], [0], [0]>} : vector<2x8x8xf32>, vector<2x8x8xf32>, vector<2x8x8xf32> -> vector<2x8x8xf32>
    "tpu.trace_stop"() : () -> ()
    %cst_21 = arith.constant dense<0xFF800000> : vector<2x8xf32>
    %58 = vector.multi_reduction <maximumf>, %57, %cst_21 [2] : vector<2x8x8xf32> to vector<2x8xf32>
    %59 = vector.shape_cast %58 : vector<2x8xf32> to vector<2x8x1xf32>
    %60 = vector.broadcast %59 : vector<2x8x1xf32> to vector<2x8x8xf32>
    %61 = arith.subf %57, %60 : vector<2x8x8xf32>
    %62 = math.exp %61 : vector<2x8x8xf32>
    %cst_22 = arith.constant dense<0.000000e+00> : vector<2x8xf32>
    %63 = vector.multi_reduction <add>, %62, %cst_22 [2] : vector<2x8x8xf32> to vector<2x8xf32>
    %64 = vector.shape_cast %63 : vector<2x8xf32> to vector<2x8x1xf32>
    %65 = vector.broadcast %64 : vector<2x8x1xf32> to vector<2x8x8xf32>
    %66 = arith.divf %62, %65 : vector<2x8x8xf32>
    "tpu.trace_start"() <{level = 10 : i32, message = "bqk,bkd->bqd"}> : () -> ()
    %cst_23 = arith.constant dense<0.000000e+00> : vector<2x8x8xf32>
    %67 = tpu.matmul %66, %56, %cst_23 {dimension_numbers = #tpu.dot_dimension_numbers<[2], [1], [1], [2], [0, 0, 0, 1, 1, 2], [0], [0]>} : vector<2x8x8xf32>, vector<2x8x8xf32>, vector<2x8x8xf32> -> vector<2x8x8xf32>
    "tpu.trace_stop"() : () -> ()
    %68 = tpu.concatenate %25, %39, %53, %67 in 2 : vector<2x8x8xf32>, vector<2x8x8xf32>, vector<2x8x8xf32>, vector<2x8x8xf32> -> vector<2x8x32xf32>
    %69 = vector.shape_cast %68 : vector<2x8x32xf32> to vector<16x32xf32>
    %c0_24 = arith.constant 0 : index
    %c0_25 = arith.constant 0 : index
    %c0_26 = arith.constant 0 : index
    %70 = vector.load %arg5[%c0_24, %c0_25, %c0_26] : memref<1x32x32xf32, #tpu.memory_space<vmem>>, vector<1x32x32xf32>
    %71 = vector.shape_cast %70 : vector<1x32x32xf32> to vector<32x32xf32>
    %cst_27 = arith.constant dense<0.000000e+00> : vector<16x32xf32>
    %72 = tpu.matmul %69, %71, %cst_27 {dimension_numbers = #tpu.dot_dimension_numbers<[1], [0], [0], [1], [0, 0, 1, 1], [], []>} : vector<16x32xf32>, vector<32x32xf32>, vector<16x32xf32> -> vector<16x32xf32>
    %c0_28 = arith.constant 0 : index
    %c0_29 = arith.constant 0 : index
    %c0_30 = arith.constant 0 : index
    %73 = vector.load %arg6[%c0_28, %c0_29, %c0_30] : memref<1x1x32xf32, #tpu.memory_space<vmem>>, vector<1x1x32xf32>
    %74 = vector.shape_cast %73 : vector<1x1x32xf32> to vector<1x32xf32>
    %75 = vector.broadcast %74 : vector<1x32xf32> to vector<16x32xf32>
    %76 = arith.addf %72, %75 : vector<16x32xf32>
    %77 = arith.addf %3, %76 : vector<16x32xf32>
    %c0_31 = arith.constant 0 : index
    %c0_32 = arith.constant 0 : index
    %c0_33 = arith.constant 0 : index
    %78 = vector.load %arg7[%c0_31, %c0_32, %c0_33] : memref<1x1x32xf32, #tpu.memory_space<vmem>>, vector<1x1x32xf32>
    %79 = vector.shape_cast %78 : vector<1x1x32xf32> to vector<1x32xf32>
    %c0_34 = arith.constant 0 : index
    %c0_35 = arith.constant 0 : index
    %c0_36 = arith.constant 0 : index
    %80 = vector.load %arg8[%c0_34, %c0_35, %c0_36] : memref<1x1x32xf32, #tpu.memory_space<vmem>>, vector<1x1x32xf32>
    %81 = vector.shape_cast %80 : vector<1x1x32xf32> to vector<1x32xf32>
    %cst_37 = arith.constant dense<0.000000e+00> : vector<16xf32>
    %82 = vector.multi_reduction <add>, %77, %cst_37 [1] : vector<16x32xf32> to vector<16xf32>
    %83 = vector.shape_cast %82 : vector<16xf32> to vector<16x1xf32>
    %cst_38 = arith.constant 3.200000e+01 : f32
    %84 = vector.broadcast %cst_38 : f32 to vector<16x1xf32>
    %85 = arith.divf %83, %84 : vector<16x1xf32>
    %86 = vector.broadcast %85 : vector<16x1xf32> to vector<16x32xf32>
    %87 = arith.subf %77, %86 : vector<16x32xf32>
    %88 = arith.mulf %87, %87 : vector<16x32xf32>
    %cst_39 = arith.constant dense<0.000000e+00> : vector<16xf32>
    %89 = vector.multi_reduction <add>, %88, %cst_39 [1] : vector<16x32xf32> to vector<16xf32>
    %90 = vector.shape_cast %89 : vector<16xf32> to vector<16x1xf32>
    %cst_40 = arith.constant 3.200000e+01 : f32
    %91 = vector.broadcast %cst_40 : f32 to vector<16x1xf32>
    %92 = arith.divf %90, %91 : vector<16x1xf32>
    %93 = vector.broadcast %85 : vector<16x1xf32> to vector<16x32xf32>
    %94 = arith.subf %77, %93 : vector<16x32xf32>
    %cst_41 = arith.constant 9.99999974E-6 : f32
    %95 = vector.broadcast %cst_41 : f32 to vector<16x1xf32>
    %96 = arith.addf %92, %95 : vector<16x1xf32>
    %97 = math.rsqrt %96 : vector<16x1xf32>
    %98 = vector.broadcast %97 : vector<16x1xf32> to vector<16x32xf32>
    %99 = arith.mulf %94, %98 : vector<16x32xf32>
    %100 = vector.broadcast %79 : vector<1x32xf32> to vector<16x32xf32>
    %101 = arith.mulf %99, %100 : vector<16x32xf32>
    %102 = vector.broadcast %81 : vector<1x32xf32> to vector<16x32xf32>
    %103 = arith.addf %101, %102 : vector<16x32xf32>
    %c0_42 = arith.constant 0 : index
    %c0_43 = arith.constant 0 : index
    %c0_44 = arith.constant 0 : index
    %104 = vector.load %arg9[%c0_42, %c0_43, %c0_44] : memref<1x32x64xf32, #tpu.memory_space<vmem>>, vector<1x32x64xf32>
    %105 = vector.shape_cast %104 : vector<1x32x64xf32> to vector<32x64xf32>
    %cst_45 = arith.constant dense<0.000000e+00> : vector<16x64xf32>
    %106 = tpu.matmul %103, %105, %cst_45 {dimension_numbers = #tpu.dot_dimension_numbers<[1], [0], [0], [1], [0, 0, 1, 1], [], []>} : vector<16x32xf32>, vector<32x64xf32>, vector<16x64xf32> -> vector<16x64xf32>
    %c0_46 = arith.constant 0 : index
    %c0_47 = arith.constant 0 : index
    %c0_48 = arith.constant 0 : index
    %107 = vector.load %arg10[%c0_46, %c0_47, %c0_48] : memref<1x1x64xf32, #tpu.memory_space<vmem>>, vector<1x1x64xf32>
    %108 = vector.shape_cast %107 : vector<1x1x64xf32> to vector<1x64xf32>
    %109 = vector.broadcast %108 : vector<1x64xf32> to vector<16x64xf32>
    %110 = arith.addf %106, %109 : vector<16x64xf32>
    %cst_49 = arith.constant 0.000000e+00 : f32
    %111 = vector.broadcast %cst_49 : f32 to vector<16x64xf32>
    %112 = arith.maximumf %110, %111 : vector<16x64xf32>
    %c0_50 = arith.constant 0 : index
    %c0_51 = arith.constant 0 : index
    %c0_52 = arith.constant 0 : index
    %113 = vector.load %arg11[%c0_50, %c0_51, %c0_52] : memref<1x64x32xf32, #tpu.memory_space<vmem>>, vector<1x64x32xf32>
    %114 = vector.shape_cast %113 : vector<1x64x32xf32> to vector<64x32xf32>
    %cst_53 = arith.constant dense<0.000000e+00> : vector<16x32xf32>
    %115 = tpu.matmul %112, %114, %cst_53 {dimension_numbers = #tpu.dot_dimension_numbers<[1], [0], [0], [1], [0, 0, 1, 1], [], []>} : vector<16x64xf32>, vector<64x32xf32>, vector<16x32xf32> -> vector<16x32xf32>
    %116 = arith.addf %103, %115 : vector<16x32xf32>
    %c0_54 = arith.constant 0 : index
    %c0_55 = arith.constant 0 : index
    %c0_56 = arith.constant 0 : index
    %117 = vector.load %arg12[%c0_54, %c0_55, %c0_56] : memref<1x1x32xf32, #tpu.memory_space<vmem>>, vector<1x1x32xf32>
    %118 = vector.shape_cast %117 : vector<1x1x32xf32> to vector<1x32xf32>
    %119 = vector.broadcast %118 : vector<1x32xf32> to vector<16x32xf32>
    %120 = arith.addf %116, %119 : vector<16x32xf32>
    %c0_57 = arith.constant 0 : index
    %c0_58 = arith.constant 0 : index
    %c0_59 = arith.constant 0 : index
    %121 = vector.load %arg13[%c0_57, %c0_58, %c0_59] : memref<1x1x32xf32, #tpu.memory_space<vmem>>, vector<1x1x32xf32>
    %122 = vector.shape_cast %121 : vector<1x1x32xf32> to vector<1x32xf32>
    %c0_60 = arith.constant 0 : index
    %c0_61 = arith.constant 0 : index
    %c0_62 = arith.constant 0 : index
    %123 = vector.load %arg14[%c0_60, %c0_61, %c0_62] : memref<1x1x32xf32, #tpu.memory_space<vmem>>, vector<1x1x32xf32>
    %124 = vector.shape_cast %123 : vector<1x1x32xf32> to vector<1x32xf32>
    %cst_63 = arith.constant dense<0.000000e+00> : vector<16xf32>
    %125 = vector.multi_reduction <add>, %120, %cst_63 [1] : vector<16x32xf32> to vector<16xf32>
    %126 = vector.shape_cast %125 : vector<16xf32> to vector<16x1xf32>
    %cst_64 = arith.constant 3.200000e+01 : f32
    %127 = vector.broadcast %cst_64 : f32 to vector<16x1xf32>
    %128 = arith.divf %126, %127 : vector<16x1xf32>
    %129 = vector.broadcast %128 : vector<16x1xf32> to vector<16x32xf32>
    %130 = arith.subf %120, %129 : vector<16x32xf32>
    %131 = arith.mulf %130, %130 : vector<16x32xf32>
    %cst_65 = arith.constant dense<0.000000e+00> : vector<16xf32>
    %132 = vector.multi_reduction <add>, %131, %cst_65 [1] : vector<16x32xf32> to vector<16xf32>
    %133 = vector.shape_cast %132 : vector<16xf32> to vector<16x1xf32>
    %cst_66 = arith.constant 3.200000e+01 : f32
    %134 = vector.broadcast %cst_66 : f32 to vector<16x1xf32>
    %135 = arith.divf %133, %134 : vector<16x1xf32>
    %136 = vector.broadcast %128 : vector<16x1xf32> to vector<16x32xf32>
    %137 = arith.subf %120, %136 : vector<16x32xf32>
    %cst_67 = arith.constant 9.99999974E-6 : f32
    %138 = vector.broadcast %cst_67 : f32 to vector<16x1xf32>
    %139 = arith.addf %135, %138 : vector<16x1xf32>
    %140 = math.rsqrt %139 : vector<16x1xf32>
    %141 = vector.broadcast %140 : vector<16x1xf32> to vector<16x32xf32>
    %142 = arith.mulf %137, %141 : vector<16x32xf32>
    %143 = vector.broadcast %122 : vector<1x32xf32> to vector<16x32xf32>
    %144 = arith.mulf %142, %143 : vector<16x32xf32>
    %145 = vector.broadcast %124 : vector<1x32xf32> to vector<16x32xf32>
    %146 = arith.addf %144, %145 : vector<16x32xf32>
    %c0_68 = arith.constant 0 : index
    %c0_69 = arith.constant 0 : index
    %147 = vector.load %arg16[%c0_68, %c0_69] : memref<16x32xf32, #tpu.memory_space<vmem>>, vector<16x32xf32>
    tpu.vector_store %arg16[%c0_68, %c0_69], %146 {strides = array<i32>} : memref<16x32xf32, #tpu.memory_space<vmem>>, vector<16x32xf32>,
    %c1_i32 = arith.constant 1 : i32
    %148 = arith.cmpi eq, %arg1, %c1_i32 : i32
    %149 = arith.extui %148 : i1 to i32
    %c0_i32_70 = arith.constant 0 : i32
    %150 = arith.cmpi ne, %149, %c0_i32_70 : i32
    scf.if %150 {
      %c0_71 = arith.constant 0 : index
      %c0_72 = arith.constant 0 : index
      %151 = vector.load %arg15[%c0_71, %c0_72] : memref<16x32xf32, #tpu.memory_space<vmem>>, vector<16x32xf32>
      tpu.vector_store %arg15[%c0_71, %c0_72], %146 {strides = array<i32>} : memref<16x32xf32, #tpu.memory_space<vmem>>, vector<16x32xf32>,
    } else {
    }
    return
  }
  func.func @transform_0(%arg0: i32, %arg1: i32) -> (i32, i32) {
    %c0_i32 = arith.constant 0 : i32
    %c0_i32_0 = arith.constant 0 : i32
    return %arg0, %c0_i32 : i32, i32
  }
  func.func @transform_1(%arg0: i32, %arg1: i32) -> (i32, i32, i32) {
    %c0_i32 = arith.constant 0 : i32
    %c0_i32_0 = arith.constant 0 : i32
    %c0_i32_1 = arith.constant 0 : i32
    return %arg1, %c0_i32, %c0_i32_0 : i32, i32, i32
  }
  func.func @transform_2(%arg0: i32, %arg1: i32) -> (i32, i32, i32) {
    %c0_i32 = arith.constant 0 : i32
    %c0_i32_0 = arith.constant 0 : i32
    %c0_i32_1 = arith.constant 0 : i32
    return %arg1, %c0_i32, %c0_i32_0 : i32, i32, i32
  }
  func.func @transform_3(%arg0: i32, %arg1: i32) -> (i32, i32, i32) {
    %c0_i32 = arith.constant 0 : i32
    %c0_i32_0 = arith.constant 0 : i32
    %c0_i32_1 = arith.constant 0 : i32
    return %arg1, %c0_i32, %c0_i32_0 : i32, i32, i32
  }
  func.func @transform_4(%arg0: i32, %arg1: i32) -> (i32, i32, i32) {
    %c0_i32 = arith.constant 0 : i32
    %c0_i32_0 = arith.constant 0 : i32
    %c0_i32_1 = arith.constant 0 : i32
    return %arg1, %c0_i32, %c0_i32_0 : i32, i32, i32
  }
  func.func @transform_5(%arg0: i32, %arg1: i32) -> (i32, i32, i32) {
    %c0_i32 = arith.constant 0 : i32
    %c0_i32_0 = arith.constant 0 : i32
    %c0_i32_1 = arith.constant 0 : i32
    return %arg1, %c0_i32, %c0_i32_0 : i32, i32, i32
  }
  func.func @transform_6(%arg0: i32, %arg1: i32) -> (i32, i32, i32) {
    %c0_i32 = arith.constant 0 : i32
    %c0_i32_0 = arith.constant 0 : i32
    %c0_i32_1 = arith.constant 0 : i32
    return %arg1, %c0_i32, %c0_i32_0 : i32, i32, i32
  }
  func.func @transform_7(%arg0: i32, %arg1: i32) -> (i32, i32, i32) {
    %c0_i32 = arith.constant 0 : i32
    %c0_i32_0 = arith.constant 0 : i32
    %c0_i32_1 = arith.constant 0 : i32
    return %arg1, %c0_i32, %c0_i32_0 : i32, i32, i32
  }
  func.func @transform_8(%arg0: i32, %arg1: i32) -> (i32, i32, i32) {
    %c0_i32 = arith.constant 0 : i32
    %c0_i32_0 = arith.constant 0 : i32
    %c0_i32_1 = arith.constant 0 : i32
    return %arg1, %c0_i32, %c0_i32_0 : i32, i32, i32
  }
  func.func @transform_9(%arg0: i32, %arg1: i32) -> (i32, i32, i32) {
    %c0_i32 = arith.constant 0 : i32
    %c0_i32_0 = arith.constant 0 : i32
    %c0_i32_1 = arith.constant 0 : i32
    return %arg1, %c0_i32, %c0_i32_0 : i32, i32, i32
  }
  func.func @transform_10(%arg0: i32, %arg1: i32) -> (i32, i32, i32) {
    %c0_i32 = arith.constant 0 : i32
    %c0_i32_0 = arith.constant 0 : i32
    %c0_i32_1 = arith.constant 0 : i32
    return %arg1, %c0_i32, %c0_i32_0 : i32, i32, i32
  }
  func.func @transform_11(%arg0: i32, %arg1: i32) -> (i32, i32, i32) {
    %c0_i32 = arith.constant 0 : i32
    %c0_i32_0 = arith.constant 0 : i32
    %c0_i32_1 = arith.constant 0 : i32
    return %arg1, %c0_i32, %c0_i32_0 : i32, i32, i32
  }
  func.func @transform_12(%arg0: i32, %arg1: i32) -> (i32, i32, i32) {
    %c0_i32 = arith.constant 0 : i32
    %c0_i32_0 = arith.constant 0 : i32
    %c0_i32_1 = arith.constant 0 : i32
    return %arg1, %c0_i32, %c0_i32_0 : i32, i32, i32
  }
  func.func @transform_13(%arg0: i32, %arg1: i32) -> (i32, i32) {
    %c0_i32 = arith.constant 0 : i32
    %c0_i32_0 = arith.constant 0 : i32
    return %arg0, %c0_i32 : i32, i32
  }
}

</mosaic_0001>

<bundles_post_ra>
// kernel: tpu_custom_call.1
= control target key start
LH: loop header
LB: loop body
LE: loop exit
PB: predicated region body
PF: predicated region fallthrough
CT: control target
= control target key end

     0   :  { %s3539_s0 = inlined_call_operand.hbm [shape: f32[16,32], index: 0, kind: input, shape index: {}]   ;;  %s3540_s1 = inlined_call_operand.vmem [shape: f32[2,32,96], index: 1, kind: input, shape index: {}]   ;;  %s3541_s2 = inlined_call_operand.vmem [shape: f32[2,1,96], index: 2, kind: input, shape index: {}]   ;;  %s3542_s3 = inlined_call_operand.vmem [shape: f32[2,32,32], index: 3, kind: input, shape index: {}]   ;;  %s3543_s4 = inlined_call_operand.vmem [shape: f32[2,1,32], index: 4, kind: input, shape index: {}]   ;;  %s3544_s5 = inlined_call_operand.vmem [shape: f32[2,1,32], index: 5, kind: input, shape index: {}]   ;;  %s3545_s6 = inlined_call_operand.vmem [shape: f32[2,1,32], index: 6, kind: input, shape index: {}]   ;;  %s3546_s7 = inlined_call_operand.vmem [shape: f32[2,32,64], index: 7, kind: input, shape index: {}]   ;;  %s3547_s8 = inlined_call_operand.vmem [shape: f32[2,1,64], index: 8, kind: input, shape index: {}]   ;;  %s3548_s9 = inlined_call_operand.vmem [shape: f32[2,64,32], index: 9, kind: input, shape index: {}]   ;;  %s3549_s10 = inlined_call_operand.vmem [shape: f32[2,1,32], index: 10, kind: input, shape index: {}]   ;;  %s3550_s11 = inlined_call_operand.vmem [shape: f32[2,1,32], index: 11, kind: input, shape index: {}]   ;;  %s3551_s12 = inlined_call_operand.vmem [shape: f32[2,1,32], index: 12, kind: input, shape index: {}]   ;;  %s3552_s13 = inlined_call_operand.hbm [shape: f32[16,32], index: 13, kind: output, shape index: {}]  }
   0x1   :  { %3556 = sst [smem:[#allocation12_spill]] %s3539_s0 }
   0x2   :  { %3557 = sst [smem:[#allocation13_spill]] %s3540_s1 }
   0x3   :  { %3558 = sst [smem:[#allocation14_spill]] %s3542_s3 }
   0x4   :  { %3559 = sst [smem:[#allocation15_spill]] %s3552_s13 }
   0x5   :  { %18 = vsyncpa [#allocation4], 0 }
   0x6   :  { %19 = vsyncpa [#allocation5], 0  ;;  %s3196_s25 = smov 0   ;;  %s3198_s26 = smov 0  }
   0x7   :  { %s3200_s27 = smov 0  }
   0x8 LB: > { %3560 = sst [smem:[#allocation9_spill]] %s3099_s26  ;;  %s3553_s28 = sadd.s32 4294967295, %s3103_s27   ;;  %s3103_s27 = sphi %s3200_s27, %s25_s27   ;;  %s3099_s26 = sphi %s3198_s26, %s3578_s26   ;;  %s3095_s25 = sphi %s3196_s25, %s3577_s25  }
   0x9   : > { %3561 = sst [smem:[#allocation10_spill]] %s3103_s27  ;;  %s34_s29 = sadd.s32 1, %s3099_s26 }
   0xa   : > { %p35_p0 = scmp.ge.s32.totalorder %s34_s29, 2  ;;  %p2667_p1 = scmp.ge.s32.totalorder %s3103_s27, 1 }
   0xb   : > { %p406_p2 = scmp.lt.s32.totalorder %s3103_s27, 3  ;;  %p3223_p4 = scmp.eq.s32.totalorder %s3553_s28, 0 }
   0xc   : > { %s3580_s29 = smov (%p35_p0, %s34_s29), 0  ;;  %s3105_s15 = smov [#allocation3]  }
   0xd   : > { %3562 = sst [smem:[#allocation11_spill]] %s3580_s29  ;;  %p3217_p3 = pnand %p2667_p1, %p406_p2 }
   0xe   : > { %s421_s16 = sshll.u32 %s3105_s15, 4  ;;  %s422_s16 = int_to_ptr.vmem [resolvable:$true] %s421_s16 }
   0xf   : > { %p2930_p5 = pneg %p3217_p3  ;;  %s3034_s17 = scalar_lea.vmem %s422_s16, 256 }
  0x10   : > { %p3035_p8 = scmp.ne.s32.totalorder %s422_s16, %s3034_s17  ;;  %p3042_p11 = scmp.lt.s32.totalorder %s422_s16, %s422_s16 }
  0x11   : > { %p2931_p6 = pnand %p3223_p4, %p2930_p5  ;;  %p3043_p12 = scmp.lt.s32.totalorder %s3034_s17, %s3034_s17 }
  0x13   : > { %p3025_p7 = pneg %p2931_p6  ;;  %p3044_p13 = por %p3043_p12, %p3042_p11 }
  0x15   : > { %p3037_p9 = pnand %p3035_p8, %p3025_p7 }
  0x17   : > { %p3038_p10 = pneg %p3037_p9 }
  0x19   : > { %p3045_p0 = pnand %p3044_p13, %p3038_p10 }
  0x1b   : > { %3048 = shalt.err (!%p3045_p0)
}
  0x1c   : > { %s3106_s18 = smov 128   ;;  %s3107_s19 = smov 8  }
  0x1d   : > { %s3565_s0 = sld [smem:[#allocation12_spill]] }
  0x1f   : > { %517 = sbr.rel (%p3217_p3) target bundleno = 3967 (0xf7f), region = 72 }
  0x23   : > { %2933 = dma.hbm_to_vmem [thread:$0]  (!%p2931_p6), %s3565_s0, 256, %s422_s16, [#allocation4], %s3106_s18, %s3106_s18, %s3107_s19  }
  0x24   : > { %3086 = dma.done.wait (%p3223_p4), [#allocation4], 256  }
  0x25   : > { %3088 = vsyncadd (%p3223_p4), [#allocation4], 4294967040  ;;  %p596_p1 = scmp.lt.s32.totalorder %s3095_s25, 1  ;;  %s3566_s1 = sld [smem:[#allocation13_spill]] }
  0x26   : > { %s3567_s3 = sld [smem:[#allocation14_spill]]  ;;  %p2680_p2 = scmp.ne.s32.totalorder %s3095_s25, 0 }
  0x27   : > { %s3242_s22 = scalar_select %p596_p1, %s3095_s25, 1 }
  0x29   : > { %s2726_s23 = sshll.u32 %s3242_s22, 5  ;;  %s633_s27 = scalar_lea.vmem %s3549_s10, %s3242_s22 }
  0x2a   : > { %s3272_s16 = scalar_lea.vmem %s3546_s7, %s2726_s23  ;;  %s636_s14 = scalar_lea.vmem %s3550_s11, %s3242_s22 }
  0x2b   : > { %s600_s17 = scalar_lea.vmem %s3566_s1, %s2726_s23  ;;  %s625_s1 = scalar_lea.vmem %s3547_s8, %s3242_s22 }
  0x2c   : > { %s3255_s20 = scalar_lea.vmem %s3567_s3, %s2726_s23  ;;  %s2729_s3 = sshll.u32 %s3242_s22, 6 }
  0x2d   : > { %s3282_s0 = scalar_lea.vmem %s3548_s9, %s2729_s3  ;;  %s639_s13 = scalar_lea.vmem %s3551_s12, %s3242_s22 }
  0x2e   : > { %644 = sbr.rel (%p2680_p2) target bundleno = 53 (0x35), region = 80 }
  0x33   : > { %v645_v0 = vld [vmem:[#allocation3] sm:$0xff]  ;;  %vm647_vm0 = vcmask 261120   ;;  %v646_v1 = vld [vmem:[#allocation3 + $0x8] sm:$0xff] }
  0x34   : > { %648 = vst.msk [vmem:[#allocation2] sm:$0xff] %vm647_vm0, %v645_v0  ;;  %649 = vst.msk [vmem:[#allocation2 + $0x8] sm:$0xff] %vm647_vm0, %v646_v1 }
  0x35 PF: > { %v655_v2 = vld [vmem:[%s600_s17 + $0x18] sm:$0xff]  ;;  %v654_v3 = vld [vmem:[%s600_s17 + $0x10] sm:$0xff]  ;;  %vm663_vm1 = vcmask 261120   ;;  %v653_v5 = vld [vmem:[%s600_s17 + $0x8] sm:$0xff]  ;;  %v3108_v8 = vmov 0.0   ;;  %vm3109_vm2 = vmmov 0   ;;  %s3568_s30 = scalar_lea.vmem %s3541_s2, %s3242_s22 }
  0x36   : > { %2790 = vmatprep.subr.mxu1 %v655_v2  ;;  %v652_v6 = vld [vmem:[%s600_s17] sm:$0xff]  ;;  %2811 = vmatprep.subr.mxu0 %v3108_v8  ;;  %s3110_s18 = smov 96   ;;  %vm748_vm3 = vcmask 64512   ;;  %s3111_s19 = smov 64   ;;  %vm2093_vm4 = vcmask 195584   ;;  %vm2090_vm5 = vcmask 130048  }
  0x37   : > { %2791 = vmatpush3.msra.mxu1 %v655_v2  ;;  %2813 = vmatprep.mubr.msk.f32.mxu0 %vm3109_vm2, %v3108_v8  ;;  %v2681_v10 = vld [vmem:[%s3568_s30] ss:$0 sm:$0xff]  ;;  %s3112_s28 = smov 88   ;;  %s3113_s21 = smov 120   ;;  %vm2337_vm6 = vcmask 523264  }
  0x38   : > { %2792 = vmatprep.subr.mxu1 %v654_v3  ;;  %s3114_s26 = smov 56   ;;  %s3115_s29 = smov 80  }
  0x39   : > { %2793 = vmatpush3.msra.mxu1 %v654_v3  ;;  %s3116_s24 = smov 112   ;;  %s3117_s23 = smov 48  }
  0x3a   : > { %2794 = vmatprep.subr.mxu1 %v653_v5  ;;  %s3118_s15 = smov 72   ;;  %s3119_s3 = smov 104  }
  0x3b   : > { %v3297_v4 = vld [vmem:[#allocation2] sm:$0xff]  ;;  %2795 = vmatpush3.msra.mxu1 %v653_v5  ;;  %v3301_v7 = vld [vmem:[#allocation2 + $0x8] sm:$0xff]  ;;  %s3120_s17 = smov 40   ;;  %s3121_s30 = smov 8  }
  0x3c   : > { %2798 = vmatprep.mubr.msk.f32.mxu1 %vm663_vm1, %v3297_v4  ;;  %2796 = vmatprep.subr.mxu1 %v652_v6  ;;  %p2721_p3 = scmp.ne.s32.totalorder %s3095_s25, 1 }
  0x3d   : > { %2797 = vmatpush3.msra.mxu1 %v652_v6 }
  0x3e   : > { %2799 = vmatmul.mubr.msk.f32.vlgmr.msra.gmra.mxu1 %vm663_vm1, %v3301_v7  ;;  %2801 = vmatprep.subr.mxu1 %v3108_v8 }
  0x3f   : > { %2803 = vmatprep.mubr.msk.f32.mxu1 %vm3109_vm2, %v3108_v8 }
  0xfe   : > { %v2800_v9 = vpop.f32.mrf.mxu1 }
  0xff   : > { %v3319_v13 = vadd.f32 %v2800_v9, %v2681_v10 }
 0x100   : > { %v736_v11 = vpop.f32.mrf.mxu1 }
 0x101   : > { %v3316_v12 = vadd.f32 %v2681_v10, %v736_v11 }
 0x103   : > { %746 = vrot.lane.b32.xlu0 %v3316_v12, %s3110_s18 }
 0x107   : > { %824 = vrot.lane.b32.xlu0 %v3319_v13, %s3110_s18  ;;  %s3122_s18 = smov 16  }
 0x175   : > { %v747_v14 = vpop.permute.xlu0 %746 }
 0x176   : > { %2802 = vmatpush3.xpose.msk.msra.mxu1 %vm748_vm3, %v747_v14 }
 0x177   : > { %2806 = vmatprep.subr.mxu1 %v3108_v8 }
 0x179   : > { %2804 = vmatmul.mubr.msk.f32.vlgmr.msra.gmra.mxu1 %vm748_vm3, %v3316_v12  ;;  %v825_v15 = vpop.permute.xlu0 %824 }
 0x17a   : > { %2807 = vmatpush3.xpose.msk.msra.mxu1 %vm748_vm3, %v825_v15  ;;  %2808 = vmatprep.mubr.msk.f32.mxu1 %vm3109_vm2, %v3108_v8 }
 0x17b   : > { %2816 = vmatprep.subr.mxu1 %v3108_v8 }
 0x17d   : > { %2809 = vmatmul.mubr.msk.f32.vlgmr.msra.gmra.mxu1 %vm748_vm3, %v3319_v13 }
 0x17e   : > { %2818 = vmatprep.mubr.msk.f32.mxu1 %vm3109_vm2, %v3108_v8 }
 0x239   : > { %v819_v16 = vpop.f32.mrf.mxu1 }
 0x23a   : > { %v900_v17 = vsel %vm748_vm3, %v819_v16, -inf }
 0x23b   : > { %901 = vmax.xlane.f32.xlu1 %v900_v17  ;;  %v2805_v18 = vpop.f32.mrf.mxu1 }
 0x23d   : > { %v896_v19 = vpop.f32.mrf.mxu1 }
 0x23e   : > { %v903_v20 = vsel %vm748_vm3, %v896_v19, -inf }
 0x23f   : > { %904 = vmax.xlane.f32.xlu1 %v903_v20  ;;  %v2810_v21 = vpop.f32.mrf.mxu1 }
 0x250   : > { %922 = vrot.lane.b32.xlu1 %v3316_v12, %s3111_s19 }
 0x254   : > { %998 = vrot.lane.b32.xlu1 %v3319_v13, %s3111_s19  ;;  %s3123_s19 = smov 24  }
 0x258   : > { %1076 = vrot.lane.b32.xlu1 %v3316_v12, %s3112_s28 }
 0x25c   : > { %1154 = vrot.lane.b32.xlu1 %v3319_v13, %s3112_s28 }
 0x2c4   : > { %v902_v22 = vpop.xlane.xlu1 %901 }
 0x2c5   : > { %v906_v23 = vsub.f32 %v819_v16, %v902_v22 }
 0x2c7   : > { %v908_v24 = vmul.f32 1.442695, %v906_v23 }
 0x2c8   : > { %v905_v25 = vpop.xlane.xlu1 %904 }
 0x2c9   : > { %2983 = vpow2.f32 %v908_v24  ;;  %v907_v26 = vsub.f32 %v896_v19, %v905_v25 }
 0x2cb   : > { %v910_v27 = vmul.f32 1.442695, %v907_v26 }
 0x2cc   : > { %v923_v28 = vpop.permute.xlu1 %922 }
 0x2cd   : > { %2985 = vpow2.f32 %v910_v27  ;;  %2812 = vmatpush3.msra.mxu0 %v923_v28 }
 0x2ce   : > { %2821 = vmatprep.subr.mxu0 %v3108_v8 }
 0x2d0   : > { %v999_v29 = vpop.permute.xlu1 %998 }
 0x2d1   : > { %2817 = vmatpush3.msra.mxu1 %v999_v29 }
 0x2d2   : > { %2826 = vmatprep.subr.mxu1 %v3108_v8 }
 0x2d4   : > { %v1077_v34 = vpop.permute.xlu1 %1076 }
 0x2d6   : > { %v2984_v30 = vpop.eup %2983 }
 0x2d7   : > { %v912_v31 = vsel %vm748_vm3, %v2984_v30, 0.0 }
 0x2d8   : > { %913 = vadd.xlane.f32.xlu0 %v912_v31  ;;  %v1155_v35 = vpop.permute.xlu1 %1154 }
 0x2da   : > { %v2986_v32 = vpop.eup %2985 }
 0x2db   : > { %v915_v33 = vsel %vm748_vm3, %v2986_v32, 0.0 }
 0x2dc   : > { %916 = vadd.xlane.f32.xlu1 %v915_v33 }
 0x2ed   : > { %1152 = vrot.lane.b32.xlu1 %v3319_v13, %s3113_s21 }
 0x2ee   : > { %1074 = vrot.lane.b32.xlu0 %v3316_v12, %s3113_s21  ;;  %s3569_s21 = scalar_lea.vmem %s3543_s4, %s3242_s22 }
 0x361   : > { %v914_v36 = vpop.xlane.xlu0 %913 }
 0x362   : > { %2987 = vrcp.f32 %v914_v36 }
 0x365   : > { %v917_v37 = vpop.xlane.xlu1 %916  ;;  %v1075_v42 = vpop.permute.xlu0 %1074 }
 0x366   : > { %2989 = vrcp.f32 %v917_v37 }
 0x369   : > { %v1153_v43 = vpop.permute.xlu1 %1152 }
 0x36f   : > { %v2988_v38 = vpop.eup %2987 }
 0x370   : > { %v919_v39 = vmul.f32 %v2988_v38, %v2984_v30 }
 0x372   : > { %2814 = vmatmul.mubr.msk.f32.vlgmr.msra.gmra.mxu0 %vm748_vm3, %v919_v39 }
 0x373   : > { %v2990_v40 = vpop.eup %2989  ;;  %2822 = vmatpush3.xpose.msk.msra.mxu0 %vm748_vm3, %v1077_v34  ;;  %2823 = vmatprep.mubr.msk.f32.mxu0 %vm3109_vm2, %v3108_v8 }
 0x374   : > { %v921_v41 = vmul.f32 %v2990_v40, %v2986_v32  ;;  %2831 = vmatprep.subr.mxu0 %v3108_v8 }
 0x376   : > { %2819 = vmatmul.mubr.msk.f32.vlgmr.msra.gmra.mxu1 %vm748_vm3, %v921_v41  ;;  %2824 = vmatmul.mubr.msk.f32.vlgmr.msra.gmra.mxu0 %vm748_vm3, %v1075_v42 }
 0x377   : > { %2827 = vmatpush3.xpose.msk.msra.mxu1 %vm748_vm3, %v1155_v35  ;;  %2828 = vmatprep.mubr.msk.f32.mxu1 %vm3109_vm2, %v3108_v8 }
 0x378   : > { %2836 = vmatprep.subr.mxu1 %v3108_v8  ;;  %2833 = vmatprep.mubr.msk.f32.mxu0 %vm3109_vm2, %v3108_v8 }
 0x37a   : > { %2829 = vmatmul.mubr.msk.f32.vlgmr.msra.gmra.mxu1 %vm748_vm3, %v1153_v43 }
 0x37b   : > { %2838 = vmatprep.mubr.msk.f32.mxu1 %vm3109_vm2, %v3108_v8 }
 0x432   : > { %v3362_v44 = vpop.f32.mrf.mxu0 }
 0x434   : > { %v2815_v45 = vpop.f32.mrf.mxu0 }
 0x436   : > { %v3364_v46 = vpop.f32.mrf.mxu1  ;;  %v1148_v47 = vpop.f32.mrf.mxu0 }
 0x437   : > { %v1230_v48 = vsel %vm748_vm3, %v1148_v47, -inf }
 0x438   : > { %v2820_v49 = vpop.f32.mrf.mxu1  ;;  %1231 = vmax.xlane.f32.xlu1 %v1230_v48  ;;  %v2825_v50 = vpop.f32.mrf.mxu0 }
 0x43a   : > { %v1226_v51 = vpop.f32.mrf.mxu1 }
 0x43b   : > { %v1233_v52 = vsel %vm748_vm3, %v1226_v51, -inf }
 0x43c   : > { %1234 = vmax.xlane.f32.xlu0 %v1233_v52  ;;  %v2830_v53 = vpop.f32.mrf.mxu1 }
 0x449   : > { %1252 = vrot.lane.b32.xlu1 %v3316_v12, %s3114_s26 }
 0x44d   : > { %1406 = vrot.lane.b32.xlu1 %v3316_v12, %s3115_s29 }
 0x451   : > { %1484 = vrot.lane.b32.xlu1 %v3319_v13, %s3115_s29  ;;  %s3570_s29 = scalar_lea.vmem %s3544_s5, %s3242_s22 }
 0x452   : > { %1328 = vrot.lane.b32.xlu0 %v3319_v13, %s3114_s26 }
 0x456   : > { %1404 = vrot.lane.b32.xlu0 %v3316_v12, %s3116_s24 }
 0x4c1   : > { %v1232_v54 = vpop.xlane.xlu1 %1231 }
 0x4c2   : > { %v1236_v55 = vsub.f32 %v1148_v47, %v1232_v54 }
 0x4c4   : > { %v1238_v56 = vmul.f32 1.442695, %v1236_v55 }
 0x4c5   : > { %v1253_v57 = vpop.permute.xlu1 %1252  ;;  %v1235_v58 = vpop.xlane.xlu0 %1234 }
 0x4c6   : > { %2991 = vpow2.f32 %v1238_v56  ;;  %v1237_v59 = vsub.f32 %v1226_v51, %v1235_v58  ;;  %2832 = vmatpush3.msra.mxu0 %v1253_v57 }
 0x4c7   : > { %2841 = vmatprep.subr.mxu0 %v3108_v8 }
 0x4c8   : > { %v1240_v60 = vmul.f32 1.442695, %v1237_v59 }
 0x4c9   : > { %v1329_v61 = vpop.permute.xlu0 %1328  ;;  %v1407_v2 = vpop.permute.xlu1 %1406 }
 0x4ca   : > { %2993 = vpow2.f32 %v1240_v60  ;;  %2837 = vmatpush3.msra.mxu1 %v1329_v61 }
 0x4cb   : > { %2846 = vmatprep.subr.mxu1 %v3108_v8 }
 0x4cd   : > { %v1485_v3 = vpop.permute.xlu1 %1484  ;;  %v1405_v15 = vpop.permute.xlu0 %1404 }
 0x4d3   : > { %v2992_v62 = vpop.eup %2991 }
 0x4d4   : > { %v1242_v63 = vsel %vm748_vm3, %v2992_v62, 0.0 }
 0x4d5   : > { %1243 = vadd.xlane.f32.xlu1 %v1242_v63 }
 0x4d7   : > { %v2994_v0 = vpop.eup %2993 }
 0x4d8   : > { %v1245_v1 = vsel %vm748_vm3, %v2994_v0, 0.0 }
 0x4d9   : > { %1246 = vadd.xlane.f32.xlu1 %v1245_v1 }
 0x4ea   : > { %1482 = vrot.lane.b32.xlu1 %v3319_v13, %s3116_s24 }
 0x55e   : > { %v1244_v5 = vpop.xlane.xlu1 %1243 }
 0x55f   : > { %2995 = vrcp.f32 %v1244_v5 }
 0x562   : > { %v1247_v6 = vpop.xlane.xlu1 %1246 }
 0x563   : > { %2997 = vrcp.f32 %v1247_v6 }
 0x566   : > { %v1483_v16 = vpop.permute.xlu1 %1482 }
 0x56c   : > { %v2996_v9 = vpop.eup %2995 }
 0x56d   : > { %v1249_v10 = vmul.f32 %v2996_v9, %v2992_v62 }
 0x56f   : > { %2834 = vmatmul.mubr.msk.f32.vlgmr.msra.gmra.mxu0 %vm748_vm3, %v1249_v10 }
 0x570   : > { %v2998_v11 = vpop.eup %2997  ;;  %2842 = vmatpush3.xpose.msk.msra.mxu0 %vm748_vm3, %v1407_v2  ;;  %2843 = vmatprep.mubr.msk.f32.mxu0 %vm3109_vm2, %v3108_v8 }
 0x571   : > { %v1251_v14 = vmul.f32 %v2998_v11, %v2994_v0  ;;  %2851 = vmatprep.subr.mxu0 %v3108_v8 }
 0x573   : > { %2839 = vmatmul.mubr.msk.f32.vlgmr.msra.gmra.mxu1 %vm748_vm3, %v1251_v14  ;;  %2844 = vmatmul.mubr.msk.f32.vlgmr.msra.gmra.mxu0 %vm748_vm3, %v1405_v15 }
 0x574   : > { %2847 = vmatpush3.xpose.msk.msra.mxu1 %vm748_vm3, %v1485_v3  ;;  %2848 = vmatprep.mubr.msk.f32.mxu1 %vm3109_vm2, %v3108_v8 }
 0x575   : > { %2856 = vmatprep.subr.mxu1 %v3108_v8  ;;  %2853 = vmatprep.mubr.msk.f32.mxu0 %vm3109_vm2, %v3108_v8 }
 0x577   : > { %2849 = vmatmul.mubr.msk.f32.vlgmr.msra.gmra.mxu1 %vm748_vm3, %v1483_v16 }
 0x578   : > { %2858 = vmatprep.mubr.msk.f32.mxu1 %vm3109_vm2, %v3108_v8 }
 0x62f   : > { %v3394_v17 = vpop.f32.mrf.mxu0 }
 0x631   : > { %v2835_v18 = vpop.f32.mrf.mxu0 }
 0x632   : > { %v2099_v18 = vld [vmem:[%s3255_s20 + $0x18] sm:$0xff] }
 0x633   : > { %v3396_v19 = vpop.f32.mrf.mxu1  ;;  %v1478_v20 = vpop.f32.mrf.mxu0 }
 0x634   : > { %v1560_v21 = vsel %vm748_vm3, %v1478_v20, -inf }
 0x635   : > { %v2840_v22 = vpop.f32.mrf.mxu1  ;;  %1561 = vmax.xlane.f32.xlu0 %v1560_v21  ;;  %v2845_v23 = vpop.f32.mrf.mxu0 }
 0x637   : > { %v1556_v24 = vpop.f32.mrf.mxu1 }
 0x638   : > { %v1563_v25 = vsel %vm748_vm3, %v1556_v24, -inf }
 0x639   : > { %1564 = vmax.xlane.f32.xlu1 %v1563_v25  ;;  %v2850_v26 = vpop.f32.mrf.mxu1 }
 0x64a   : > { %1582 = vrot.lane.b32.xlu1 %v3316_v12, %s3117_s23 }
 0x64b   : > { %1658 = vrot.lane.b32.xlu0 %v3319_v13, %s3117_s23 }
 0x64e   : > { %1736 = vrot.lane.b32.xlu1 %v3316_v12, %s3118_s15 }
 0x652   : > { %1814 = vrot.lane.b32.xlu1 %v3319_v13, %s3118_s15  ;;  %s3571_s15 = scalar_lea.vmem %s3545_s6, %s3242_s22 }
 0x656   : > { %1812 = vrot.lane.b32.xlu1 %v3319_v13, %s3119_s3 }
 0x6be   : > { %v1562_v27 = vpop.xlane.xlu0 %1561 }
 0x6bf   : > { %v1566_v28 = vsub.f32 %v1478_v20, %v1562_v27  ;;  %v2096_v20 = vld [vmem:[%s3255_s20] sm:$0xff] }
 0x6c1   : > { %v1568_v29 = vmul.f32 1.442695, %v1566_v28 }
 0x6c2   : > { %v1565_v30 = vpop.xlane.xlu1 %1564  ;;  %v1659_v31 = vpop.permute.xlu0 %1658 }
 0x6c3   : > { %2999 = vpow2.f32 %v1568_v29  ;;  %v1567_v32 = vsub.f32 %v1556_v24, %v1565_v30  ;;  %2857 = vmatpush3.msra.mxu1 %v1659_v31 }
 0x6c4   : > { %2866 = vmatprep.subr.mxu1 %v3108_v8 }
 0x6c5   : > { %v1570_v33 = vmul.f32 1.442695, %v1567_v32 }
 0x6c6   : > { %v1583_v34 = vpop.permute.xlu1 %1582 }
 0x6c7   : > { %3001 = vpow2.f32 %v1570_v33  ;;  %2852 = vmatpush3.msra.mxu0 %v1583_v34 }
 0x6c8   : > { %2861 = vmatprep.subr.mxu0 %v3108_v8 }
 0x6ca   : > { %v1737_v41 = vpop.permute.xlu1 %1736 }
 0x6ce   : > { %v1815_v47 = vpop.permute.xlu1 %1814 }
 0x6d0   : > { %v3000_v35 = vpop.eup %2999 }
 0x6d1   : > { %v1572_v36 = vsel %vm748_vm3, %v3000_v35, 0.0 }
 0x6d2   : > { %1573 = vadd.xlane.f32.xlu0 %v1572_v36  ;;  %v1813_v50 = vpop.permute.xlu1 %1812 }
 0x6d4   : > { %v3002_v37 = vpop.eup %3001 }
 0x6d5   : > { %v1575_v38 = vsel %vm748_vm3, %v3002_v37, 0.0 }
 0x6d6   : > { %1576 = vadd.xlane.f32.xlu0 %v1575_v38 }
 0x6ec   : > { %1734 = vrot.lane.b32.xlu0 %v3316_v12, %s3119_s3 }
 0x75b   : > { %v1574_v39 = vpop.xlane.xlu0 %1573 }
 0x75c   : > { %3003 = vrcp.f32 %v1574_v39 }
 0x75f   : > { %v1577_v40 = vpop.xlane.xlu0 %1576 }
 0x760   : > { %3005 = vrcp.f32 %v1577_v40 }
 0x763   : > { %v1735_v49 = vpop.permute.xlu0 %1734 }
 0x769   : > { %v3004_v42 = vpop.eup %3003 }
 0x76a   : > { %v1579_v43 = vmul.f32 %v3004_v42, %v3000_v35 }
 0x76c   : > { %2854 = vmatmul.mubr.msk.f32.vlgmr.msra.gmra.mxu0 %vm748_vm3, %v1579_v43 }
 0x76d   : > { %v3006_v45 = vpop.eup %3005  ;;  %2862 = vmatpush3.xpose.msk.msra.mxu0 %vm748_vm3, %v1737_v41  ;;  %2863 = vmatprep.mubr.msk.f32.mxu0 %vm3109_vm2, %v3108_v8 }
 0x76e   : > { %v1581_v48 = vmul.f32 %v3006_v45, %v3002_v37  ;;  %2871 = vmatprep.subr.mxu0 %v3108_v8 }
 0x770   : > { %2859 = vmatmul.mubr.msk.f32.vlgmr.msra.gmra.mxu1 %vm748_vm3, %v1581_v48  ;;  %2864 = vmatmul.mubr.msk.f32.vlgmr.msra.gmra.mxu0 %vm748_vm3, %v1735_v49 }
 0x771   : > { %2867 = vmatpush3.xpose.msk.msra.mxu1 %vm748_vm3, %v1815_v47  ;;  %2868 = vmatprep.mubr.msk.f32.mxu1 %vm3109_vm2, %v3108_v8 }
 0x772   : > { %2876 = vmatprep.subr.mxu1 %v3108_v8  ;;  %2873 = vmatprep.mubr.msk.f32.mxu0 %vm3109_vm2, %v3108_v8 }
 0x774   : > { %2869 = vmatmul.mubr.msk.f32.vlgmr.msra.gmra.mxu1 %vm748_vm3, %v1813_v50 }
 0x775   : > { %2878 = vmatprep.mubr.msk.f32.mxu1 %vm3109_vm2, %v3108_v8 }
 0x82c   : > { %v1654_v51 = vpop.f32.mrf.mxu0 }
 0x82e   : > { %v2855_v52 = vpop.f32.mrf.mxu0 }
 0x830   : > { %v1730_v53 = vpop.f32.mrf.mxu1  ;;  %v1808_v54 = vpop.f32.mrf.mxu0 }
 0x831   : > { %v1890_v55 = vsel %vm748_vm3, %v1808_v54, -inf }
 0x832   : > { %v2860_v56 = vpop.f32.mrf.mxu1  ;;  %1891 = vmax.xlane.f32.xlu0 %v1890_v55  ;;  %v2865_v57 = vpop.f32.mrf.mxu0  ;;  %v2237_v55 = vld [vmem:[%s3272_s16 + $0x10] sm:$0xff] }
 0x833   : > { %v2236_v56 = vld [vmem:[%s3272_s16 + $0x8] sm:$0xff]  ;;  %v2235_v57 = vld [vmem:[%s3272_s16] sm:$0xff] }
 0x834   : > { %v1886_v58 = vpop.f32.mrf.mxu1 }
 0x835   : > { %v1893_v59 = vsel %vm748_vm3, %v1886_v58, -inf }
 0x836   : > { %1894 = vmax.xlane.f32.xlu1 %v1893_v59  ;;  %v2870_v60 = vpop.f32.mrf.mxu1  ;;  %v2335_v59 = vld [vmem:[%s3282_s0 + $0x30] sm:$0xff] }
 0x837   : > { %v2334_v60 = vld [vmem:[%s3282_s0 + $0x28] sm:$0xff] }
 0x847   : > { %1912 = vrot.lane.b32.xlu1 %v3316_v12, %s3120_s17 }
 0x84b   : > { %2066 = vrot.lane.b32.xlu1 %v3394_v17, %s3121_s30 }
 0x84f   : > { %2068 = vrot.lane.b32.xlu1 %v3396_v19, %s3121_s30  ;;  %v2098_v19 = vld [vmem:[%s3255_s20 + $0x10] sm:$0xff] }
 0x853   : > { %2076 = vrot.lane.b32.xlu1 %v1730_v53, %s3122_s18 }
 0x8bb   : > { %v1892_v8 = vpop.xlane.xlu0 %1891 }
 0x8bc   : > { %v1896_v61 = vsub.f32 %v1808_v54, %v1892_v8  ;;  %v2238_v54 = vld [vmem:[%s3272_s16 + $0x18] sm:$0xff]  ;;  %v2333_v8 = vld [vmem:[%s3282_s0 + $0x20] sm:$0xff] }
 0x8be   : > { %v1898_v62 = vmul.f32 1.442695, %v1896_v61 }
 0x8bf   : > { %v1895_v63 = vpop.xlane.xlu1 %1894 }
 0x8c0   : > { %3007 = vpow2.f32 %v1898_v62  ;;  %v1897_v0 = vsub.f32 %v1886_v58, %v1895_v63  ;;  %v2336_v58 = vld [vmem:[%s3282_s0 + $0x38] sm:$0xff] }
 0x8c2   : > { %v1900_v1 = vmul.f32 1.442695, %v1897_v0 }
 0x8c3   : > { %v1913_v2 = vpop.permute.xlu1 %1912 }
 0x8c4   : > { %3009 = vpow2.f32 %v1900_v1  ;;  %2872 = vmatpush3.msra.mxu0 %v1913_v2 }
 0x8c5   : > { %2881 = vmatprep.subr.mxu0 %v2099_v18 }
 0x8c7   : > { %v2067_v25 = vpop.permute.xlu1 %2066 }
 0x8c8   : > { %v2088_v28 = vsel %vm748_vm3, %v3362_v44, %v2067_v25  ;;  %v2708_v44 = vld [vmem:[%s3569_s21] ss:$0 sm:$0xff] }
 0x8cb   : > { %v2069_v26 = vpop.permute.xlu1 %2068 }
 0x8cc   : > { %v2089_v33 = vsel %vm748_vm3, %v3364_v46, %v2069_v26 }
 0x8cd   : > { %v3008_v12 = vpop.eup %3007 }
 0x8ce   : > { %v1902_v3 = vsel %vm748_vm3, %v3008_v12, 0.0 }
 0x8cf   : > { %1903 = vadd.xlane.f32.xlu0 %v1902_v3  ;;  %v2077_v29 = vpop.permute.xlu1 %2076  ;;  %v2711_v3 = vld [vmem:[%s3570_s29] ss:$0 sm:$0xff] }
 0x8d0   : > { %v2092_v34 = vsel %vm2090_vm5, %v2089_v33, %v2077_v29 }
 0x8d1   : > { %v3010_v5 = vpop.eup %3009 }
 0x8d2   : > { %v1905_v6 = vsel %vm748_vm3, %v3010_v5, 0.0 }
 0x8d3   : > { %1906 = vadd.xlane.f32.xlu0 %v1905_v6  ;;  %v2712_v6 = vld [vmem:[%s3571_s15] ss:$0 sm:$0xff] }
 0x8e9   : > { %1988 = vrot.lane.b32.xlu0 %v3319_v13, %s3120_s17  ;;  %v2097_v13 = vld [vmem:[%s3255_s20 + $0x8] sm:$0xff] }
 0x8ed   : > { %2074 = vrot.lane.b32.xlu0 %v1654_v51, %s3122_s18 }
 0x958   : > { %v1904_v9 = vpop.xlane.xlu0 %1903 }
 0x959   : > { %3011 = vrcp.f32 %v1904_v9 }
 0x95c   : > { %v1907_v10 = vpop.xlane.xlu0 %1906 }
 0x95d   : > { %3013 = vrcp.f32 %v1907_v10 }
 0x960   : > { %v1989_v11 = vpop.permute.xlu0 %1988 }
 0x961   : > { %2877 = vmatpush3.msra.mxu1 %v1989_v11 }
 0x962   : > { %2892 = vmatprep.subr.mxu1 %v2238_v54 }
 0x964   : > { %v2075_v27 = vpop.permute.xlu0 %2074 }
 0x965   : > { %v2091_v30 = vsel %vm2090_vm5, %v2088_v28, %v2075_v27  ;;  %v2718_v28 = vld [vmem:[%s633_s27] ss:$0 sm:$0xff] }
 0x966   : > { %v3012_v14 = vpop.eup %3011 }
 0x967   : > { %v1909_v15 = vmul.f32 %v3012_v14, %v3008_v12 }
 0x969   : > { %2874 = vmatmul.mubr.msk.f32.vlgmr.msra.gmra.mxu0 %vm748_vm3, %v1909_v15 }
 0x96a   : > { %v3014_v16 = vpop.eup %3013  ;;  %2882 = vmatpush3.msra.mxu0 %v2099_v18  ;;  %v2331_v18 = vld [vmem:[%s3282_s0 + $0x10] sm:$0xff] }
 0x96b   : > { %v1911_v17 = vmul.f32 %v3014_v16, %v3010_v5  ;;  %2883 = vmatprep.subr.mxu0 %v2098_v19 }
 0x96c   : > { %2884 = vmatpush3.msra.mxu0 %v2098_v19  ;;  %v2330_v19 = vld [vmem:[%s3282_s0 + $0x8] sm:$0xff] }
 0x96d   : > { %2879 = vmatmul.mubr.msk.f32.vlgmr.msra.gmra.mxu1 %vm748_vm3, %v1911_v17  ;;  %2885 = vmatprep.subr.mxu0 %v2097_v13  ;;  %v2332_v17 = vld [vmem:[%s3282_s0 + $0x18] sm:$0xff] }
 0x96e   : > { %2886 = vmatpush3.msra.mxu0 %v2097_v13  ;;  %2893 = vmatpush3.msra.mxu1 %v2238_v54  ;;  %v2329_v13 = vld [vmem:[%s3282_s0] sm:$0xff] }
 0x96f   : > { %2887 = vmatprep.subr.mxu0 %v2096_v20  ;;  %2894 = vmatprep.subr.mxu1 %v2237_v55  ;;  %v2720_v54 = vld [vmem:[%s639_s13] ss:$0 sm:$0xff] }
 0x970   : > { %2888 = vmatpush3.msra.mxu0 %v2096_v20  ;;  %2895 = vmatpush3.msra.mxu1 %v2237_v55  ;;  %v2713_v20 = vld [vmem:[%s625_s1] ss:$0 sm:$0xff] }
 0x971   : > { %2896 = vmatprep.subr.mxu1 %v2236_v56  ;;  %2903 = vmatprep.subr.mxu0 %v2336_v58 }
 0x972   : > { %2897 = vmatpush3.msra.mxu1 %v2236_v56 }
 0x973   : > { %2898 = vmatprep.subr.mxu1 %v2235_v57 }
 0x974   : > { %2899 = vmatpush3.msra.mxu1 %v2235_v57 }
 0xa29   : > { %v1984_v21 = vpop.f32.mrf.mxu0 }
 0xa2a   : > { %2082 = vrot.lane.b32.xlu0 %v1984_v21, %s3123_s19 }
 0xa2b   : > { %v2875_v22 = vpop.f32.mrf.mxu0 }
 0xa2d   : > { %v2060_v23 = vpop.f32.mrf.mxu1 }
 0xa2e   : > { %2084 = vrot.lane.b32.xlu1 %v2060_v23, %s3123_s19 }
 0xa2f   : > { %v2880_v24 = vpop.f32.mrf.mxu1 }
 0xa9c   : > { %v2083_v31 = vpop.permute.xlu0 %2082 }
 0xa9d   : > { %v2094_v32 = vsel %vm2093_vm4, %v2091_v30, %v2083_v31 }
 0xa9e   : > { %2889 = vmatprep.mubr.msk.f32.mxu0 %vm663_vm1, %v2094_v32 }
 0xaa0   : > { %v2085_v35 = vpop.permute.xlu1 %2084 }
 0xaa1   : > { %v2095_v36 = vsel %vm2093_vm4, %v2092_v34, %v2085_v35 }
 0xaa2   : > { %2890 = vmatmul.mubr.msk.f32.vlgmr.msra.gmra.mxu0 %vm663_vm1, %v2095_v36 }
 0xaa3   : > { %2904 = vmatpush3.msra.mxu0 %v2336_v58 }
 0xaa4   : > { %2905 = vmatprep.subr.mxu0 %v2335_v59 }
 0xaa5   : > { %2906 = vmatpush3.msra.mxu0 %v2335_v59 }
 0xaa6   : > { %2907 = vmatprep.subr.mxu0 %v2334_v60 }
 0xaa7   : > { %2908 = vmatpush3.msra.mxu0 %v2334_v60 }
 0xaa8   : > { %2909 = vmatprep.subr.mxu0 %v2333_v8 }
 0xaa9   : > { %2910 = vmatpush3.msra.mxu0 %v2333_v8 }
 0xaaa   : > { %2911 = vmatprep.subr.mxu0 %v2332_v17 }
 0xaab   : > { %2912 = vmatpush3.msra.mxu0 %v2332_v17 }
 0xaac   : > { %2913 = vmatprep.subr.mxu0 %v2331_v18 }
 0xaad   : > { %2914 = vmatpush3.msra.mxu0 %v2331_v18 }
 0xaae   : > { %2915 = vmatprep.subr.mxu0 %v2330_v19 }
 0xaaf   : > { %2916 = vmatpush3.msra.mxu0 %v2330_v19 }
 0xab0   : > { %2917 = vmatprep.subr.mxu0 %v2329_v13 }
 0xab1   : > { %2918 = vmatpush3.msra.mxu0 %v2329_v13 }
 0xb62   : > { %v2891_v37 = vpop.f32.mrf.mxu0 }
 0xb63   : > { %v2185_v38 = vadd.f32 %v2891_v37, %v2708_v44 }
 0xb64   : > { %v2179_v39 = vpop.f32.mrf.mxu0 }
 0xb65   : > { %v2180_v40 = vadd.f32 %v2708_v44, %v2179_v39  ;;  %v2189_v41 = vadd.f32 %v2185_v38, %v3301_v7 }
 0xb67   : > { %v2195_v42 = vsel %vm663_vm1, %v2189_v41, 0.0  ;;  %v2188_v46 = vadd.f32 %v2180_v40, %v3297_v4 }
 0xb68   : > { %2196 = vadd.xlane.f32.xlu1 %v2195_v42 }
 0xb69   : > { %v2192_v43 = vsel %vm663_vm1, %v2188_v46, 0.0 }
 0xb6a   : > { %2193 = vadd.xlane.f32.xlu0 %v2192_v43 }
 0xbf1   : > { %v2197_v45 = vpop.xlane.xlu1 %2196 }
 0xbf2   : > { %v2200_v47 = vmul.f32 0.03125, %v2197_v45 }
 0xbf3   : > { %v2194_v48 = vpop.xlane.xlu0 %2193 }
 0xbf4   : > { %v2199_v49 = vmul.f32 0.03125, %v2194_v48  ;;  %v2202_v50 = vsub.f32 %v2189_v41, %v2200_v47 }
 0xbf6   : > { %v2201_v51 = vsub.f32 %v2188_v46, %v2199_v49  ;;  %v2204_v53 = vmul.f32 %v2202_v50, %v2202_v50 }
 0xbf8   : > { %v2203_v52 = vmul.f32 %v2201_v51, %v2201_v51  ;;  %v2208_v4 = vsel %vm663_vm1, %v2204_v53, 0.0 }
 0xbfa   : > { %v2205_v7 = vsel %vm663_vm1, %v2203_v52, 0.0 }
 0xbfb   : > { %2206 = vadd.xlane.f32.xlu0 %v2205_v7  ;;  %v2719_v7 = vld [vmem:[%s636_s14] ss:$0 sm:$0xff] }
 0xbff   : > { %2209 = vadd.xlane.f32.xlu0 %v2208_v4 }
 0xc84   : > { %v2207_v61 = vpop.xlane.xlu0 %2206 }
 0xc85   : > { %v2211_v62 = vmul.f32 0.03125, %v2207_v61 }
 0xc87   : > { %v2213_v63 = vadd.f32 1e-05, %v2211_v62 }
 0xc88   : > { %v2210_v0 = vpop.xlane.xlu0 %2209 }
 0xc89   : > { %3015 = vrsqrt.f32 %v2213_v63  ;;  %v2212_v1 = vmul.f32 0.03125, %v2210_v0 }
 0xc8b   : > { %v2214_v2 = vadd.f32 1e-05, %v2212_v1 }
 0xc8d   : > { %3017 = vrsqrt.f32 %v2214_v2 }
 0xc96   : > { %v3016_v12 = vpop.eup %3015 }
 0xc97   : > { %v2217_v5 = vmul.f32 %v3016_v12, %v2201_v51 }
 0xc99   : > { %v2225_v9 = vmul.f32 %v2711_v3, %v2217_v5 }
 0xc9a   : > { %v3018_v10 = vpop.eup %3017 }
 0xc9b   : > { %v2218_v11 = vmul.f32 %v3018_v10, %v2202_v50  ;;  %v2233_v14 = vadd.f32 %v2712_v6, %v2225_v9 }
 0xc9d   : > { %v2226_v15 = vmul.f32 %v2711_v3, %v2218_v11  ;;  %2900 = vmatprep.mubr.msk.f32.mxu1 %vm663_vm1, %v2233_v14 }
 0xc9f   : > { %v2234_v16 = vadd.f32 %v2712_v6, %v2226_v15 }
 0xca1   : > { %2901 = vmatmul.mubr.msk.f32.vlgmr.msra.gmra.mxu1 %vm663_vm1, %v2234_v16 }
 0xd61   : > { %v2902_v21 = vpop.f32.mrf.mxu1 }
 0xd62   : > { %v2324_v22 = vadd.f32 %v2902_v21, %v2713_v20 }
 0xd63   : > { %v2318_v23 = vpop.f32.mrf.mxu1 }
 0xd64   : > { %v2319_v24 = vadd.f32 %v2713_v20, %v2318_v23  ;;  %v2328_v26 = vmax.f32 %v2324_v22, 0.0 }
 0xd66   : > { %v2327_v25 = vmax.f32 %v2319_v24, 0.0 }
 0xd68   : > { %2919 = vmatprep.mubr.msk.f32.mxu0 %vm2337_vm6, %v2327_v25 }
 0xd69   : > { %2920 = vmatmul.mubr.msk.f32.vlgmr.msra.gmra.mxu0 %vm2337_vm6, %v2328_v26 }
 0xe29   : > { %v2921_v27 = vpop.f32.mrf.mxu0 }
 0xe2a   : > { %v2420_v29 = vadd.f32 %v2921_v27, %v2234_v16 }
 0xe2b   : > { %v2410_v30 = vpop.f32.mrf.mxu0 }
 0xe2c   : > { %v2419_v31 = vadd.f32 %v2410_v30, %v2233_v14  ;;  %v2429_v32 = vadd.f32 %v2718_v28, %v2420_v29 }
 0xe2e   : > { %v2435_v33 = vsel %vm663_vm1, %v2429_v32, 0.0  ;;  %v2428_v34 = vadd.f32 %v2718_v28, %v2419_v31 }
 0xe2f   : > { %2436 = vadd.xlane.f32.xlu0 %v2435_v33 }
 0xe30   : > { %v2432_v35 = vsel %vm663_vm1, %v2428_v34, 0.0 }
 0xe31   : > { %2433 = vadd.xlane.f32.xlu1 %v2432_v35 }
 0xeb8   : > { %v2437_v36 = vpop.xlane.xlu0 %2436 }
 0xeb9   : > { %v2439_v44 = vmul.f32 0.03125, %v2437_v36 }
 0xeba   : > { %v2434_v37 = vpop.xlane.xlu1 %2433 }
 0xebb   : > { %v2441_v38 = vsub.f32 %v2429_v32, %v2439_v44  ;;  %v2438_v39 = vmul.f32 0.03125, %v2434_v37 }
 0xebd   : > { %v2440_v40 = vsub.f32 %v2428_v34, %v2438_v39  ;;  %v2443_v41 = vmul.f32 %v2441_v38, %v2441_v38 }
 0xebf   : > { %v2447_v42 = vsel %vm663_vm1, %v2443_v41, 0.0  ;;  %v2442_v46 = vmul.f32 %v2440_v40, %v2440_v40 }
 0xec0   : > { %2448 = vadd.xlane.f32.xlu0 %v2447_v42 }
 0xec1   : > { %v2444_v43 = vsel %vm663_vm1, %v2442_v46, 0.0 }
 0xec2   : > { %2445 = vadd.xlane.f32.xlu1 %v2444_v43 }
 0xf49   : > { %v2449_v45 = vpop.xlane.xlu0 %2448 }
 0xf4a   : > { %v2451_v47 = vmul.f32 0.03125, %v2449_v45 }
 0xf4b   : > { %v2446_v48 = vpop.xlane.xlu1 %2445 }
 0xf4c   : > { %v2453_v49 = vadd.f32 1e-05, %v2451_v47  ;;  %v2450_v50 = vmul.f32 0.03125, %v2446_v48 }
 0xf4e   : > { %3019 = vrsqrt.f32 %v2453_v49  ;;  %v2452_v51 = vadd.f32 1e-05, %v2450_v50 }
 0xf50   : > { %3021 = vrsqrt.f32 %v2452_v51 }
 0xf5b   : > { %v3020_v52 = vpop.eup %3019 }
 0xf5c   : > { %v2457_v53 = vmul.f32 %v3020_v52, %v2441_v38 }
 0xf5d   : > { %v3022_v4 = vpop.eup %3021 }
 0xf5e   : > { %v2465_v55 = vmul.f32 %v2719_v7, %v2457_v53  ;;  %v2456_v56 = vmul.f32 %v3022_v4, %v2440_v40 }
 0xf60   : > { %v2473_v57 = vadd.f32 %v2720_v54, %v2465_v55  ;;  %v2464_v58 = vmul.f32 %v2719_v7, %v2456_v56  ;;  %2479 = sbr.rel (%p2721_p3) target bundleno = 3942 (0xf66), region = 84 }
 0xf62   : > { %2475 = vst.msk [vmem:[#allocation2 + $0x8] sm:$0xff] %vm663_vm1, %v2473_v57  ;;  %v2472_v59 = vadd.f32 %v2720_v54, %v2464_v58 }
 0xf64   : > { %2474 = vst.msk [vmem:[#allocation2] sm:$0xff] %vm663_vm1, %v2472_v59 }
 0xf65   : > { %2480 = vst.msk [vmem:[#allocation6] sm:$0xff] %vm663_vm1, %v2472_v59  ;;  %2481 = vst.msk [vmem:[#allocation6 + $0x8] sm:$0xff] %vm663_vm1, %v2473_v57 }
 0xf66 PF: > { %s3572_s14 = sld [smem:[#allocation10_spill]]  ;;  %s3124_s28 = smov [#allocation6]  }
 0xf67   : > { %s2491_s21 = sshll.u32 %s3124_s28, 4  ;;  %s2492_s21 = int_to_ptr.vmem [resolvable:$true] %s2491_s21 }
 0xf68   : > { %s3049_s16 = scalar_lea.vmem %s2492_s21, 256  ;;  %p3056_p8 = scmp.lt.s32.totalorder %s2492_s21, %s2492_s21 }
 0xf69   : > { %p3050_p5 = scmp.ne.s32.totalorder %s2492_s21, %s3049_s16  ;;  %p3057_p9 = scmp.lt.s32.totalorder %s3049_s16, %s3049_s16 }
 0xf6b   : > { %p3058_p10 = por %p3057_p9, %p3056_p8 }
 0xf6c   : > { %s3573_s22 = sadd.s32 4294967295, %s3572_s14  }
 0xf6d   : > { %p3514_p4 = scmp.eq.s32.totalorder %s3573_s22, 1 }
 0xf6f   : > { %p3051_p6 = pnand %p3050_p5, %p3514_p4 }
 0xf71   : > { %p3052_p7 = pneg %p3051_p6 }
 0xf73   : > { %p3059_p11 = pnand %p3058_p10, %p3052_p7 }
 0xf75   : > { %3062 = shalt.err (!%p3059_p11)
}
 0xf76   : > { %s3125_s25 = smov 128   ;;  %s3575_s24 = sld [smem:[#allocation15_spill]] }
 0xf7c   : > { %2927 = dma.vmem_to_hbm [thread:$0]  (%p3514_p4), %s2492_s21, 256, %s3575_s24, [#allocation5], %s3125_s25, %s3125_s25, %s3121_s30  }
 0xf7d   : > { %3090 = dma.done.wait (%p3514_p4), [#allocation5], 256  }
 0xf7e   : > { %3092 = vsyncadd (%p3514_p4), [#allocation5], 4294967040 }
 0xf7f PF: > { %s3576_s23 = sld [smem:[#allocation10_spill]] }
 0xf80   : > { %s3577_s25 = sld [smem:[#allocation9_spill]] }
 0xf81   : > { %s3578_s26 = sld [smem:[#allocation11_spill]] }
 0xf85   : > { %s25_s27 = sadd.s32 1, %s3576_s23  }
 0xf86   : > { %p22_p12 = scmp.ge.s32.totalorder %s25_s27, 4  }
 0xf88   :  { %24 = sbr.rel (!%p22_p12) target bundleno = 8 (0x8), region = 147 }
 0xf8d   :  { %2507 = vsyncpa [#allocation4], 1 }
 0xf8e   :  { %2509 = vsyncpa [#allocation4 + $0x1], 1 }
 0xf8f   :  { %2510 = vsyncpa [#allocation5], 1 }
 0xf90   :  { %2512 = vsyncpa [#allocation5 + $0x1], 1 }

</bundles_post_ra>
